<compile_context>
chip_gen: v7x
topology: tpu7x:2x2x1
jax: 0.10.0
libtpu: 0.0.40
codegen_flags: <defaults>
</compile_context>

<pallas_src>
import functools

import jax
import jax.numpy as jnp
from jax.experimental import pallas as pl
from jax.experimental.pallas import tpu as pltpu


def _round_up(x, m):
    return ((x + m - 1) // m) * m


# ---------------------------------------------------------------------------
# Pallas kernel: row-tiled  (tm, Dp) @ (Dp, Nout) + bias  ->  (tm, Nout)
# ---------------------------------------------------------------------------
def _project_kernel(x_ref, w_ref, b_ref, o_ref):
    # x_ref: (tm, Dp)    patch rows (zero-padded contraction columns)
    # w_ref: (Dp, Nout)  weight, pre-transposed in the wrapper, resident
    # b_ref: (1, Nout)   bias (fp32)
    # o_ref: (tm, Nout)
    acc = jnp.dot(x_ref[...], w_ref[...], preferred_element_type=jnp.float32)
    o_ref[...] = (acc + b_ref[...]).astype(o_ref.dtype)


def _pick_tm(M, align, max_tile):
    """Large row tile, preferring an aligned divisor of M (no row padding) and
    >= 2 grid steps whenever M allows it (keeps both v7x TensorCores busy)."""
    max_tile = max(align, (max_tile // align) * align)
    if M <= align:
        return M  # cannot split below sublane granularity; full-dim block
    cap = min(max_tile, max(align, ((M + 1) // 2 // align) * align))
    for tm in range(cap, align - 1, -align):  # prefer divisors of M
        if M % tm == 0:
            return tm
    return cap  # padding path


_VMEM_BUDGET = 48 * 1024 * 1024  # leave headroom under v7x's 64 MiB physical


def _plan_row_tile(M, Dp, Nout, x_isz, out_isz, w_isz):
    """Pick tm under an explicit VMEM budget; return (tm, estimated bytes)."""
    align = max(8, 32 // x_isz)  # 8 rows f32, 16 rows bf16
    # Double-buffered x/out tiles + double-buffered (resident) weight & bias.
    fixed = 2 * (Dp * Nout * w_isz + Nout * 4)
    per_row = 2 * (Dp * x_isz + Nout * out_isz)
    avail = max(_VMEM_BUDGET - fixed, align * per_row)
    max_tile = min(512, max(align, (avail // per_row // align) * align))
    tm = _pick_tm(M, align, max_tile)
    need = fixed + tm * per_row
    return tm, need


def _project(x2d, w, b, out_dtype):
    """x2d: (M, D); w: (N, D) PyTorch nn.Linear layout; b: (N,) -> (M, N)."""
    M, D = x2d.shape
    N = w.shape[0]

    # One-time weight transpose outside the grid -> clean [M,K]x[K,N] MXU feed.
    wT = jnp.transpose(w)  # (D, N)

    # Pad contraction dim to a lane multiple: unmasked vld + full MXU K.
    Dp = _round_up(D, 128)
    if Dp != D:
        x2d = jnp.pad(x2d, ((0, 0), (0, Dp - D)))
        wT = jnp.pad(wT, ((0, Dp - D), (0, 0)))

    # Lane-dense output only when the padding waste is small; otherwise write
    # (M, N) directly (masked stores) and skip the post-slice copy.
    Npad = _round_up(N, 128)
    use_pad = (Npad == N) or ((Npad - N) * 8 <= N)  # <= 12.5% waste
    Nout = Npad if use_pad else N
    if Nout != N:
        wT = jnp.pad(wT, ((0, 0), (0, Nout - N)))
        b = jnp.pad(b, (0, Nout - N))
    b2d = b.reshape(1, Nout).astype(jnp.float32)

    x_isz = jnp.dtype(x2d.dtype).itemsize
    w_isz = jnp.dtype(wT.dtype).itemsize
    out_isz = jnp.dtype(out_dtype).itemsize
    tm, vmem_need = _plan_row_tile(M, Dp, Nout, x_isz, out_isz, w_isz)

    Mp = _round_up(M, tm)
    if Mp != M:  # only when no dividing tile exists
        x2d = jnp.pad(x2d, ((0, Mp - M), (0, 0)))

    cost = pl.CostEstimate(
        flops=2 * Mp * Dp * Nout,
        transcendentals=0,
        bytes_accessed=(Mp * Dp * x_isz + Dp * Nout * w_isz + Nout * 4
                        + Mp * Nout * out_isz),
    )

    out = pl.pallas_call(
        _project_kernel,
        out_shape=jax.ShapeDtypeStruct((Mp, Nout), out_dtype),
        grid_spec=pltpu.PrefetchScalarGridSpec(
            num_scalar_prefetch=0,
            grid=(Mp // tm,),
            in_specs=[
                pl.BlockSpec((tm, Dp), lambda i: (i, 0)),    # patch rows, tiled
                pl.BlockSpec((Dp, Nout), lambda i: (0, 0)),  # weight, resident
                pl.BlockSpec((1, Nout), lambda i: (0, 0)),   # bias, resident
            ],
            out_specs=pl.BlockSpec((tm, Nout), lambda i: (i, 0)),
        ),
        compiler_params=pltpu.CompilerParams(
            # Independent row tiles -> megacore sharding on v7x when grid >= 2
            # (which _pick_tm guarantees whenever M allows it).
            dimension_semantics=("parallel",),
            # Let XLA fuse the unfold relayout / casts of x and the weight
            # transpose into the kernel's input DMA (kills the extra HBM
            # round trip for the materialized patches array when possible).
            allow_input_fusion=[True, True, False],
            # Explicit scoped-VMEM budget; capped at v7x's 64 MiB physical.
            vmem_limit_bytes=min(64 << 20,
                                 max(32 << 20, int(vmem_need) + (4 << 20))),
        ),
        cost_estimate=cost,
    )(x2d, wT, b2d)

    if Mp != M or Nout != N:
        out = out[:M, :N]
    return out


# ---------------------------------------------------------------------------
# Module-equivalent wrapper
# ---------------------------------------------------------------------------
def patch_tokenization(x_nchw, weight, bias, *, patch_size,
                       compute_dtype=None, out_dtype=None):
    """Equivalent of Patch_Tokenization.forward.

    x_nchw: (B, C, H, W)        NCHW image
    weight: (token_len, C*p*p)  PyTorch nn.Linear weight (untransposed)
    bias:   (token_len,)        PyTorch nn.Linear bias
    compute_dtype: optional MXU input dtype (e.g. jnp.bfloat16 on v5e/v6e/v7x);
                   accumulation stays fp32.
    out_dtype: optional output dtype (e.g. jnp.bfloat16 to halve writeback);
               defaults to the input dtype.
    returns (B, num_tokens, token_len)
    """
    B, C, H, W = x_nchw.shape
    p = patch_size
    assert H % p == 0 and W % p == 0
    nH, nW = H // p, W // p
    L = nH * nW
    D = C * p * p
    token_len = weight.shape[0]

    # nn.Unfold(kernel=p, stride=p).transpose(2,1):
    #   out[b, l, c*p*p + kh*p + kw] = x[b, c, oh*p+kh, ow*p+kw], l = oh*nW+ow
    # Kept as JAX glue; allow_input_fusion lets XLA fold it into the input DMA.
    patches = x_nchw.reshape(B, C, nH, p, nW, p)
    patches = jnp.transpose(patches, (0, 2, 4, 1, 3, 5)).reshape(B * L, D)

    if out_dtype is None:
        out_dtype = x_nchw.dtype
    if compute_dtype is not None:
        patches = patches.astype(compute_dtype)
        weight = weight.astype(compute_dtype)

    out2d = _project(patches, weight, bias, out_dtype)
    return out2d.reshape(B, L, token_len)


# ---------------------------------------------------------------------------
# Reference (pure JAX) for correctness check
# ---------------------------------------------------------------------------
def patch_tokenization_ref(x_nchw, weight, bias, *, patch_size):
    B, C, H, W = x_nchw.shape
    p = patch_size
    nH, nW = H // p, W // p
    patches = x_nchw.reshape(B, C, nH, p, nW, p)
    patches = jnp.transpose(patches, (0, 2, 4, 1, 3, 5)).reshape(B, nH * nW, C * p * p)
    return patches @ weight.T + bias


if __name__ == "__main__":
    key = jax.random.PRNGKey(0)

    # --- Config A: module-like small shapes -------------------------------
    # img_size=(C,H,W)=(4,16,16), patch_size=8 -> num_tokens=4, D=256,
    # token_len=32, batch=2.
    B, C, H, W = 2, 4, 16, 16
    patch_size = 8
    token_len = 32
    D = C * patch_size * patch_size

    kx, kw, kb = jax.random.split(key, 3)
    x = jax.random.normal(kx, (B, C, H, W), dtype=jnp.float32)
    weight = jax.random.normal(kw, (token_len, D), dtype=jnp.float32) * (1.0 / D ** 0.5)
    bias = jax.random.normal(kb, (token_len,), dtype=jnp.float32) * 0.01

    ref = patch_tokenization_ref(x, weight, bias, patch_size=patch_size)
    expected_shape = (B, (H // patch_size) * (W // patch_size), token_len)

    # fp32 path (module-exact semantics, fp32 accumulate).
    fn = jax.jit(functools.partial(patch_tokenization, patch_size=patch_size))
    out = jax.block_until_ready(fn(x, weight, bias))
    assert out.shape == expected_shape, out.shape
    assert jnp.allclose(out, ref, atol=1e-4, rtol=1e-4), float(jnp.abs(out - ref).max())

    # bf16 MXU-input path (valid on v5e/v6e/v7x); fp32 accumulate, looser check.
    fn_bf16 = jax.jit(functools.partial(
        patch_tokenization, patch_size=patch_size, compute_dtype=jnp.bfloat16))
    out_bf16 = jax.block_until_ready(fn_bf16(x, weight, bias))
    assert out_bf16.shape == expected_shape, out_bf16.shape
    assert jnp.allclose(out_bf16, ref, atol=5e-2, rtol=5e-2), \
        float(jnp.abs(out_bf16 - ref).max())

    # --- Config B: exercises D padding (147->256), grid >= 2, masked-N path --
    B2, C2, H2, W2 = 4, 3, 14, 14
    p2, tok2 = 7, 64
    D2 = C2 * p2 * p2  # 147
    kx2, kw2, kb2 = jax.random.split(jax.random.PRNGKey(0), 3)
    x2 = jax.random.normal(kx2, (B2, C2, H2, W2), dtype=jnp.float32)
    w2 = jax.random.normal(kw2, (tok2, D2), dtype=jnp.float32) * (1.0 / D2 ** 0.5)
    b2 = jax.random.normal(kb2, (tok2,), dtype=jnp.float32) * 0.01

    ref2 = patch_tokenization_ref(x2, w2, b2, patch_size=p2)
    fn2 = jax.jit(functools.partial(patch_tokenization, patch_size=p2))
    out2 = jax.block_until_ready(fn2(x2, w2, b2))
    assert out2.shape == (B2, (H2 // p2) * (W2 // p2), tok2), out2.shape
    assert jnp.allclose(out2, ref2, atol=1e-4, rtol=1e-4), \
        float(jnp.abs(out2 - ref2).max())

    print("KERNEL_OK")
</pallas_src>

<mosaic_0001>
module attributes {stable_mosaic.version = 11 : i64} {
  func.func @_project_kernel(%arg0: i32, %arg1: memref<8x256xf32, #tpu.memory_space<vmem>>, %arg2: memref<256x32xf32, #tpu.memory_space<vmem>>, %arg3: memref<1x32xf32, #tpu.memory_space<vmem>>, %arg4: memref<8x32xf32, #tpu.memory_space<vmem>>) attributes {dimension_semantics = [#tpu.dimension_semantics<parallel>], iteration_bounds = array<i64: 1>, scalar_prefetch = 0 : i64, scratch_operands = 0 : i64, tpu.core_type = #tpu.core_type<tc>, window_params = [{transform_indices = @transform_0, window_bounds = array<i64: 8, 256>}, {pipeline_mode = #tpu.pipeline_mode<synchronous>, transform_indices = @transform_1, window_bounds = array<i64: 256, 32>}, {pipeline_mode = #tpu.pipeline_mode<synchronous>, transform_indices = @transform_2, window_bounds = array<i64: 1, 32>}, {transform_indices = @transform_3, window_bounds = array<i64: 8, 32>}]} {
    %c0 = arith.constant 0 : index
    %c0_0 = arith.constant 0 : index
    %0 = vector.load %arg1[%c0, %c0_0] : memref<8x256xf32, #tpu.memory_space<vmem>>, vector<8x256xf32>
    %c0_1 = arith.constant 0 : index
    %c0_2 = arith.constant 0 : index
    %1 = vector.load %arg2[%c0_1, %c0_2] : memref<256x32xf32, #tpu.memory_space<vmem>>, vector<256x32xf32>
    %cst = arith.constant dense<0.000000e+00> : vector<8x32xf32>
    %2 = tpu.matmul %0, %1, %cst {dimension_numbers = #tpu.dot_dimension_numbers<[1], [0], [0], [1], [0, 0, 1, 1], [], []>} : vector<8x256xf32>, vector<256x32xf32>, vector<8x32xf32> -> vector<8x32xf32>
    %c0_3 = arith.constant 0 : index
    %c0_4 = arith.constant 0 : index
    %3 = vector.load %arg3[%c0_3, %c0_4] : memref<1x32xf32, #tpu.memory_space<vmem>>, vector<1x32xf32>
    %4 = vector.broadcast %3 : vector<1x32xf32> to vector<8x32xf32>
    %5 = arith.addf %2, %4 : vector<8x32xf32>
    %c0_5 = arith.constant 0 : index
    %c0_6 = arith.constant 0 : index
    %6 = vector.load %arg4[%c0_5, %c0_6] : memref<8x32xf32, #tpu.memory_space<vmem>>, vector<8x32xf32>
    tpu.vector_store %arg4[%c0_5, %c0_6], %5 {strides = array<i32>} : memref<8x32xf32, #tpu.memory_space<vmem>>, vector<8x32xf32>,
    return
  }
  func.func @transform_0(%arg0: i32) -> (i32, i32) {
    %c0_i32 = arith.constant 0 : i32
    %c0_i32_0 = arith.constant 0 : i32
    return %arg0, %c0_i32 : i32, i32
  }
  func.func @transform_1(%arg0: i32) -> (i32, i32) {
    %c0_i32 = arith.constant 0 : i32
    %c0_i32_0 = arith.constant 0 : i32
    %c0_i32_1 = arith.constant 0 : i32
    return %c0_i32, %c0_i32_0 : i32, i32
  }
  func.func @transform_2(%arg0: i32) -> (i32, i32) {
    %c0_i32 = arith.constant 0 : i32
    %c0_i32_0 = arith.constant 0 : i32
    %c0_i32_1 = arith.constant 0 : i32
    return %c0_i32, %c0_i32_0 : i32, i32
  }
  func.func @transform_3(%arg0: i32) -> (i32, i32) {
    %c0_i32 = arith.constant 0 : i32
    %c0_i32_0 = arith.constant 0 : i32
    return %arg0, %c0_i32 : i32, i32
  }
}

</mosaic_0001>

<bundles_post_ra>
// kernel: patch_tokenization.2
= control target key start
LH: loop header
LB: loop body
LE: loop exit
PB: predicated region body
PF: predicated region fallthrough
CT: control target
= control target key end

     0   :  { %s562_s0 = inlined_call_operand.vmem [shape: f32[8,256], index: 0, kind: input, shape index: {}]   ;;  %s563_s1 = inlined_call_operand.vmem [shape: f32[1,32], index: 1, kind: input, shape index: {}]   ;;  %s564_s2 = inlined_call_operand.vmem [shape: f32[32,256], index: 2, kind: input, shape index: {}]   ;;  %s565_s3 = inlined_call_operand.hbm [shape: f32[8,32], index: 3, kind: output, shape index: {}]  }
   0x1   :  { %v315_v0 = vld [vmem:[%s564_s2 + $0x80] sm:$0xff]  ;;  %v316_v1 = vld [vmem:[%s564_s2 + $0x88] sm:$0xff]  ;;  %v317_v5 = vld [vmem:[%s564_s2 + $0x90] sm:$0xff] }
   0x2   :  { %v15_v2 = vld [vmem:[%s564_s2] sm:$0xff]  ;;  %v367_v3 = vpack.c.bf16 %v316_v1, %v315_v0  ;;  %v300_v4 = vld [vmem:[%s564_s2 + $0x8] sm:$0xff]  ;;  %v318_v6 = vld [vmem:[%s564_s2 + $0x98] sm:$0xff] }
   0x3   :  { %v369_v7 = vpack.c.bf16 %v300_v4, %v15_v2  ;;  %v371_v8 = vpack.c.bf16 %v318_v6, %v317_v5  ;;  %v301_v9 = vld [vmem:[%s564_s2 + $0x10] sm:$0xff]  ;;  %v302_v10 = vld [vmem:[%s564_s2 + $0x18] sm:$0xff]  ;;  %v319_v11 = vld [vmem:[%s564_s2 + $0xa0] sm:$0xff] }
   0x4   :  { %368 = vmatprep.subr.bf16.mxu0 %v367_v3  ;;  %v320_v12 = vld [vmem:[%s564_s2 + $0xa8] sm:$0xff]  ;;  %v373_v13 = vpack.c.bf16 %v302_v10, %v301_v9  ;;  %v303_v15 = vld [vmem:[%s564_s2 + $0x20] sm:$0xff]  ;;  %v321_v17 = vld [vmem:[%s564_s2 + $0xb0] sm:$0xff] }
   0x5   :  { %370 = vmatpush3.bf16.msra.mxu0 %v369_v7  ;;  %v375_v14 = vpack.c.bf16 %v320_v12, %v319_v11  ;;  %v304_v16 = vld [vmem:[%s564_s2 + $0x28] sm:$0xff]  ;;  %v322_v18 = vld [vmem:[%s564_s2 + $0xb8] sm:$0xff]  ;;  %v305_v21 = vld [vmem:[%s564_s2 + $0x30] sm:$0xff] }
   0x6   :  { %372 = vmatprep.subr.bf16.mxu0 %v371_v8  ;;  %v377_v19 = vpack.c.bf16 %v304_v16, %v303_v15  ;;  %v379_v20 = vpack.c.bf16 %v322_v18, %v321_v17  ;;  %v306_v22 = vld [vmem:[%s564_s2 + $0x38] sm:$0xff]  ;;  %v323_v23 = vld [vmem:[%s564_s2 + $0xc0] sm:$0xff]  ;;  %v324_v24 = vld [vmem:[%s564_s2 + $0xc8] sm:$0xff] }
   0x7   :  { %v174_v25 = vld [vmem:[%s562_s0 + $0x8] sm:$0xff] }
   0x8   :  { %278 = vmatprep.mubr.f32.mxu0 %v174_v25 }
   0x9   :  { %374 = vmatpush3.bf16.msra.mxu0 %v373_v13 }
   0xa   :  { %376 = vmatprep.subr.bf16.mxu0 %v375_v14 }
   0xb   :  { %8 = vsyncpa [#allocation3], 0  ;;  %v381_v26 = vpack.c.bf16 %v306_v22, %v305_v21  ;;  %v383_v27 = vpack.c.bf16 %v324_v24, %v323_v23  ;;  %v307_v28 = vld [vmem:[%s564_s2 + $0x40] sm:$0xff]  ;;  %v308_v29 = vld [vmem:[%s564_s2 + $0x48] sm:$0xff]  ;;  %s424_s28 = smov [#allocation2]   ;;  %vm284_vm0 = vcmask 261120  }
   0xc   :  { %v325_v30 = vld [vmem:[%s564_s2 + $0xd0] sm:$0xff]  ;;  %v326_v31 = vld [vmem:[%s564_s2 + $0xd8] sm:$0xff]  ;;  %v385_v32 = vpack.c.bf16 %v308_v29, %v307_v28  ;;  %v327_v36 = vld [vmem:[%s564_s2 + $0xe0] sm:$0xff]  ;;  %s292_s29 = sshll.u32 %s424_s28, 4  ;;  %s293_s29 = int_to_ptr.vmem [resolvable:$true] %s292_s29 }
   0xd   :  { %378 = vmatpush3.bf16.msra.mxu0 %v377_v19  ;;  %v387_v33 = vpack.c.bf16 %v326_v31, %v325_v30  ;;  %v309_v34 = vld [vmem:[%s564_s2 + $0x50] sm:$0xff]  ;;  %v310_v35 = vld [vmem:[%s564_s2 + $0x58] sm:$0xff]  ;;  %v328_v37 = vld [vmem:[%s564_s2 + $0xe8] sm:$0xff]  ;;  %p405_p1 = scmp.lt.s32.totalorder %s293_s29, %s293_s29 }
   0xe   :  { %380 = vmatprep.subr.bf16.mxu0 %v379_v20  ;;  %v389_v38 = vpack.c.bf16 %v310_v35, %v309_v34  ;;  %v391_v39 = vpack.c.bf16 %v328_v37, %v327_v36  ;;  %v311_v40 = vld [vmem:[%s564_s2 + $0x60] sm:$0xff]  ;;  %v312_v41 = vld [vmem:[%s564_s2 + $0x68] sm:$0xff]  ;;  %v329_v42 = vld [vmem:[%s564_s2 + $0xf0] sm:$0xff] }
   0xf   :  { %v330_v43 = vld [vmem:[%s564_s2 + $0xf8] sm:$0xff]  ;;  %v393_v44 = vpack.c.bf16 %v312_v41, %v311_v40  ;;  %v313_v46 = vld [vmem:[%s564_s2 + $0x70] sm:$0xff]  ;;  %v173_v49 = vld [vmem:[%s562_s0] sm:$0xff] }
  0x10   :  { %v395_v45 = vpack.c.bf16 %v330_v43, %v329_v42  ;;  %v314_v47 = vld [vmem:[%s564_s2 + $0x78] sm:$0xff]  ;;  %v331_v51 = vld [vmem:[%s563_s1] ss:$0 sm:$0xff]  ;;  %s400_s2 = scalar_lea.vmem %s293_s29, 128 }
  0x11   :  { %382 = vmatpush3.bf16.msra.mxu0 %v381_v26  ;;  %v397_v48 = vpack.c.bf16 %v314_v47, %v313_v46  ;;  %p401_p0 = scmp.ne.s32.totalorder %s293_s29, %s400_s2  ;;  %p406_p2 = scmp.lt.s32.totalorder %s400_s2, %s400_s2 }
  0x12   :  { %384 = vmatprep.subr.bf16.mxu0 %v383_v27 }
  0x13   :  { %p407_p3 = por %p406_p2, %p405_p1 }
  0x15   :  { %386 = vmatpush3.bf16.msra.mxu0 %v385_v32  ;;  %p408_p4 = pnand %p407_p3, %p401_p0 }
  0x16   :  { %388 = vmatprep.subr.bf16.mxu0 %v387_v33 }
  0x19   :  { %390 = vmatpush3.bf16.msra.mxu0 %v389_v38 }
  0x1a   :  { %392 = vmatprep.subr.bf16.mxu0 %v391_v39 }
  0x1d   :  { %394 = vmatpush3.bf16.msra.mxu0 %v393_v44 }
  0x1e   :  { %396 = vmatprep.subr.bf16.mxu0 %v395_v45 }
  0x21   :  { %398 = vmatpush3.bf16.msra.mxu0 %v397_v48 }
  0x24   :  { %279 = vmatmul.mubr.f32.vlgmr.msra.gmra.mrb[0].mxu0 %v173_v49 }
  0xf7   :  { %v364_v50 = vpop.f32.mrb[0].mxu0 }
  0xf8   :  { %v365_v52 = vpop.f32.mrb[1].mxu0 }
  0xf9   :  { %v366_v53 = vadd.f32 %v365_v52, %v364_v50 }
  0xfb   :  { %v281_v54 = vadd.f32 %v366_v53, %v331_v51 }
  0xfd   :  { %285 = vst.msk [vmem:[#allocation2] sm:$0xff] %vm284_vm0, %v281_v54 }
  0xfe   :  { %411 = shalt.err (!%p408_p4)
}
  0xff   :  { %s412_s4 = scalar_lea.hbm %s565_s3, 128 }
 0x100   :  { %p413_p5 = scmp.ne.s32.totalorder %s565_s3, %s412_s4  ;;  %p416_p6 = scmp.lt.u32.totalorder %s412_s4, %s565_s3 }
 0x102   :  { %p418_p7 = pnand %p416_p6, %p413_p5 }
 0x104   :  { %421 = shalt.err (!%p418_p7)
}
 0x105   :  { %295 = dma.vmem_to_hbm [thread:$0]  %s293_s29, 128, %s565_s3, [#allocation3]  }
 0x106   :  { %422 = dma.done.wait [#allocation3], 128  }
 0x107   :  { %423 = vsyncadd [#allocation3], 4294967168 }
 0x108   :  { %299 = vsyncpa [#allocation3], 1 }

</bundles_post_ra>
